<compile_context>
chip_gen: v7x
topology: tpu7x:2x2x1
jax: 0.10.0
libtpu: 0.0.40
codegen_flags: <defaults>
</compile_context>

<pallas_src>
import functools

import jax
import jax.numpy as jnp
from jax.experimental import pallas as pl
from jax.experimental.pallas import tpu as pltpu

_MIB = 1024 * 1024


@functools.lru_cache(maxsize=1)
def _vmem_capacity_bytes():
    """Best-effort VMEM capacity query; falls back to the smallest (v7x, 64 MiB/TC)."""
    try:
        info = pltpu.get_tpu_info()
        cap = int(getattr(info, "vmem_capacity_bytes", 0) or 0)
        if cap > 0:
            return cap
    except Exception:
        pass
    return 64 * _MIB


def _budgets():
    """(block_bytes_target, vmem_limit_bytes) per TPU generation."""
    cap = _vmem_capacity_bytes()
    if cap >= 96 * _MIB:              # v5e / v6e: 128 MiB VMEM
        return 8 * _MIB, 64 * _MIB
    return 4 * _MIB, 40 * _MIB        # v7x: 64 MiB VMEM per TensorCore


def _choose_tile_rows(rows, lane_width, itemsize, *, block_bytes_target,
                      vmem_limit_bytes, row_align):
    """Largest legal row tile such that:
      (a) tile rows are a multiple of `row_align` (8 for f32, 16 for bf16) unless the
          tile covers the whole array,
      (b) the in-VMEM footprint (double-buffered in+out in input dtype plus ~2
          block-sized f32 temporaries from the upcasted working set) fits the VMEM limit,
      (c) when blocks are still >= 2 MiB, prefer >= 4 grid steps so v7x's two
          TensorCores can both be fed along the "parallel" row axis."""
    rows = int(rows)
    bytes_per_row = lane_width * itemsize

    tr = max(row_align, min(8192, block_bytes_target // max(1, bytes_per_row)))
    tr = max(row_align, (tr // row_align) * row_align)

    def footprint(t):
        # 2x double-buffered input + 2x double-buffered output (input dtype)
        # + ~2 block-sized f32 temporaries (upcast x, x*x / (x-u)).
        return t * lane_width * (4 * itemsize + 2 * 4)

    while tr > row_align and footprint(tr) > int(0.85 * vmem_limit_bytes):
        tr = max(row_align, ((tr // 2) // row_align) * row_align)

    # Megacore preference: >=4 steps, but never shrink blocks below ~2 MiB
    # (per-step overhead ~0.35 us would start to dominate).
    while (pl.cdiv(rows, tr) < 4
           and tr > row_align
           and (tr // 2) * bytes_per_row >= 2 * _MIB):
        tr = max(row_align, ((tr // 2) // row_align) * row_align)

    if tr >= rows:
        return rows          # single full block (legal even if rows % 8 != 0)
    return tr


def _ln_rowwise_kernel(x_ref, g_ref, b_ref, o_ref, *, eps, inv_h):
    """General path: hidden is the full last (lane) dim of the block.
    One-pass mean/variance: two independent lane reductions."""
    x = x_ref[...].astype(jnp.float32)                      # (tr, H)
    sum_x = jnp.sum(x, axis=-1, keepdims=True)
    sum_x2 = jnp.sum(x * x, axis=-1, keepdims=True)
    u = sum_x * inv_h
    var = jnp.maximum(sum_x2 * inv_h - u * u, 0.0)          # biased variance, clamped
    inv = jax.lax.rsqrt(var + eps)
    o_ref[...] = (g_ref[...] * ((x - u) * inv) + b_ref[...]).astype(o_ref.dtype)


def _ln_folded_kernel(x_ref, seg_ref, g_ref, b_ref, o_ref, *, eps, inv_h):
    """Lane-dense path for hidden < 128: 128//H logical rows are folded into each
    128-lane slab row; per-segment sums come from a block-diagonal 0/1 matmul so all
    loads/stores stay unmasked. The two matmuls are independent (no MXU->VPU->MXU
    serialization). HIGHEST precision keeps x exact through the segment sum."""
    x = x_ref[...].astype(jnp.float32)                      # (tr, 128)
    seg = seg_ref[...]                                      # (128, 128) 0/1 f32
    sum_x = jnp.dot(x, seg, preferred_element_type=jnp.float32,
                    precision=jax.lax.Precision.HIGHEST)
    sum_x2 = jnp.dot(x * x, seg, preferred_element_type=jnp.float32,
                     precision=jax.lax.Precision.HIGHEST)
    u = sum_x * inv_h
    var = jnp.maximum(sum_x2 * inv_h - u * u, 0.0)
    inv = jax.lax.rsqrt(var + eps)
    o_ref[...] = (g_ref[...] * ((x - u) * inv) + b_ref[...]).astype(o_ref.dtype)


@functools.partial(jax.jit, static_argnames=("variance_epsilon",))
def bert_layer_norm(x, gamma, beta, variance_epsilon=1e-12):
    """x: (..., H); gamma, beta: (H,). Returns same shape/dtype as x."""
    orig_shape = x.shape
    H = int(orig_shape[-1])
    x2 = x.reshape(-1, H)
    R = int(x2.shape[0])

    g32 = gamma.astype(jnp.float32)
    b32 = beta.astype(jnp.float32)

    # Lane-dense folding only when it is free (contiguous bitcast reshape).
    fold = (H < 128) and (128 % H == 0) and ((R * H) % 128 == 0)
    if fold:
        fold_factor = 128 // H
        W = 128
        rows = (R * H) // 128
        xk = x2.reshape(rows, W)
        seg_ids = jnp.arange(W, dtype=jnp.int32) // H
        seg = (seg_ids[:, None] == seg_ids[None, :]).astype(jnp.float32)
        gk = jnp.tile(g32, fold_factor).reshape(1, W)
        bk = jnp.tile(b32, fold_factor).reshape(1, W)
    else:
        # TODO(synk): for H >= 128 that is not a multiple of 128, lane-padding W up to
        # a multiple of 128 would keep stores unmasked; BERT's 768/1024 already are.
        W = H
        rows = R
        xk = x2
        gk = g32.reshape(1, W)
        bk = b32.reshape(1, W)

    itemsize = jnp.dtype(x.dtype).itemsize
    row_align = max(8, 32 // itemsize)        # 8 for f32, 16 for bf16, 32 for fp8/int8
    block_bytes_target, vmem_limit = _budgets()
    tr = _choose_tile_rows(rows, W, itemsize,
                           block_bytes_target=block_bytes_target,
                           vmem_limit_bytes=vmem_limit,
                           row_align=row_align)
    grid = (pl.cdiv(rows, tr),)

    row_spec = pl.BlockSpec((tr, W), lambda i: (i, 0))
    vec_spec = pl.BlockSpec((1, W), lambda i: (0, 0))
    cparams = pltpu.CompilerParams(
        dimension_semantics=("parallel",),
        vmem_limit_bytes=int(vmem_limit),
    )

    if fold:
        kernel = functools.partial(_ln_folded_kernel,
                                   eps=float(variance_epsilon),
                                   inv_h=1.0 / float(H))
        out = pl.pallas_call(
            kernel,
            out_shape=jax.ShapeDtypeStruct((rows, W), x.dtype),
            grid_spec=pl.GridSpec(
                grid=grid,
                in_specs=[row_spec,
                          pl.BlockSpec((W, W), lambda i: (0, 0)),
                          vec_spec, vec_spec],
                out_specs=row_spec),
            compiler_params=cparams,
        )(xk, seg, gk, bk)
    else:
        kernel = functools.partial(_ln_rowwise_kernel,
                                   eps=float(variance_epsilon),
                                   inv_h=1.0 / float(H))
        out = pl.pallas_call(
            kernel,
            out_shape=jax.ShapeDtypeStruct((rows, W), x.dtype),
            grid_spec=pl.GridSpec(
                grid=grid,
                in_specs=[row_spec, vec_spec, vec_spec],
                out_specs=row_spec),
            compiler_params=cparams,
        )(xk, gk, bk)

    return out.reshape(orig_shape)


if __name__ == "__main__":
    def ref_ln(x, gamma, beta, eps=1e-12):
        xf = x.astype(jnp.float32)
        u = jnp.mean(xf, axis=-1, keepdims=True)
        s = jnp.mean((xf - u) ** 2, axis=-1, keepdims=True)
        return (gamma.astype(jnp.float32) * ((xf - u) / jnp.sqrt(s + eps))
                + beta.astype(jnp.float32))

    key = jax.random.PRNGKey(0)
    k1, k2, k3, k4, k5 = jax.random.split(key, 5)

    # Case 1: module-sized demo (hidden=32 < 128 -> lane-dense folded path).
    batch, seq, hidden = 2, 8, 32
    x1 = jax.random.normal(k1, (batch, seq, hidden), dtype=jnp.float32)
    gamma1 = jnp.ones((hidden,), dtype=jnp.float32)     # module init: ones
    beta1 = jnp.zeros((hidden,), dtype=jnp.float32)     # module init: zeros
    y1 = bert_layer_norm(x1, gamma1, beta1, variance_epsilon=1e-12)
    jax.block_until_ready(y1)
    assert y1.shape == x1.shape and y1.dtype == x1.dtype
    assert jnp.allclose(y1, ref_ln(x1, gamma1, beta1), atol=1e-5, rtol=1e-5), \
        "mismatch vs reference (folded path)"

    # Case 2: hidden=128, ragged row count (general row-wise path, masked tail rows).
    batch, seq, hidden = 2, 9, 128
    x2 = jax.random.normal(k2, (batch, seq, hidden), dtype=jnp.float32)
    gamma2 = jax.random.normal(k3, (hidden,), dtype=jnp.float32)
    beta2 = jax.random.normal(k4, (hidden,), dtype=jnp.float32)
    y2 = bert_layer_norm(x2, gamma2, beta2, variance_epsilon=1e-12)
    jax.block_until_ready(y2)
    assert jnp.allclose(y2, ref_ln(x2, gamma2, beta2), atol=1e-5, rtol=1e-5), \
        "mismatch vs reference (row-wise path)"

    # Case 3: bf16 input, hidden=256 (16-row alignment path, f32 compute in kernel).
    batch, seq, hidden = 3, 8, 256
    x3 = jax.random.normal(k5, (batch, seq, hidden), dtype=jnp.float32).astype(jnp.bfloat16)
    gamma3 = jnp.ones((hidden,), dtype=jnp.bfloat16)
    beta3 = jnp.zeros((hidden,), dtype=jnp.bfloat16)
    y3 = bert_layer_norm(x3, gamma3, beta3, variance_epsilon=1e-12)
    jax.block_until_ready(y3)
    assert y3.dtype == jnp.bfloat16 and y3.shape == x3.shape
    assert jnp.allclose(y3.astype(jnp.float32), ref_ln(x3, gamma3, beta3),
                        atol=5e-2, rtol=5e-2), \
        "mismatch vs reference (bf16 row-wise path)"

    print("KERNEL_OK")
</pallas_src>

<mosaic_0001>
module attributes {stable_mosaic.version = 11 : i64} {
  func.func @_ln_folded_kernel(%arg0: i32, %arg1: memref<4x128xf32, #tpu.memory_space<vmem>>, %arg2: memref<128x128xf32, #tpu.memory_space<vmem>>, %arg3: memref<1x128xf32, #tpu.memory_space<vmem>>, %arg4: memref<1x128xf32, #tpu.memory_space<vmem>>, %arg5: memref<4x128xf32, #tpu.memory_space<vmem>>) attributes {dimension_semantics = [#tpu.dimension_semantics<parallel>], iteration_bounds = array<i64: 1>, scalar_prefetch = 0 : i64, scratch_operands = 0 : i64, tpu.core_type = #tpu.core_type<tc>, window_params = [{transform_indices = @transform_0, window_bounds = array<i64: 4, 128>}, {pipeline_mode = #tpu.pipeline_mode<synchronous>, transform_indices = @transform_1, window_bounds = array<i64: 128, 128>}, {pipeline_mode = #tpu.pipeline_mode<synchronous>, transform_indices = @transform_2, window_bounds = array<i64: 1, 128>}, {pipeline_mode = #tpu.pipeline_mode<synchronous>, transform_indices = @transform_3, window_bounds = array<i64: 1, 128>}, {transform_indices = @transform_4, window_bounds = array<i64: 4, 128>}]} {
    %c0 = arith.constant 0 : index
    %c0_0 = arith.constant 0 : index
    %0 = vector.load %arg1[%c0, %c0_0] : memref<4x128xf32, #tpu.memory_space<vmem>>, vector<4x128xf32>
    %c0_1 = arith.constant 0 : index
    %c0_2 = arith.constant 0 : index
    %1 = vector.load %arg2[%c0_1, %c0_2] : memref<128x128xf32, #tpu.memory_space<vmem>>, vector<128x128xf32>
    %cst = arith.constant dense<0.000000e+00> : vector<4x128xf32>
    %2 = tpu.matmul %0, %1, %cst {dimension_numbers = #tpu.dot_dimension_numbers<[1], [0], [0], [1], [0, 0, 1, 1], [], []>, precision = #tpu.contract_precision<fp32>} : vector<4x128xf32>, vector<128x128xf32>, vector<4x128xf32> -> vector<4x128xf32>
    %3 = arith.mulf %0, %0 : vector<4x128xf32>
    %cst_3 = arith.constant dense<0.000000e+00> : vector<4x128xf32>
    %4 = tpu.matmul %3, %1, %cst_3 {dimension_numbers = #tpu.dot_dimension_numbers<[1], [0], [0], [1], [0, 0, 1, 1], [], []>, precision = #tpu.contract_precision<fp32>} : vector<4x128xf32>, vector<128x128xf32>, vector<4x128xf32> -> vector<4x128xf32>
    %cst_4 = arith.constant 3.125000e-02 : f32
    %5 = vector.broadcast %cst_4 : f32 to vector<4x128xf32>
    %6 = arith.mulf %2, %5 : vector<4x128xf32>
    %cst_5 = arith.constant 3.125000e-02 : f32
    %7 = vector.broadcast %cst_5 : f32 to vector<4x128xf32>
    %8 = arith.mulf %4, %7 : vector<4x128xf32>
    %9 = arith.mulf %6, %6 : vector<4x128xf32>
    %10 = arith.subf %8, %9 : vector<4x128xf32>
    %cst_6 = arith.constant 0.000000e+00 : f32
    %11 = vector.broadcast %cst_6 : f32 to vector<4x128xf32>
    %12 = arith.maximumf %10, %11 : vector<4x128xf32>
    %cst_7 = arith.constant 9.99999996E-13 : f32
    %13 = vector.broadcast %cst_7 : f32 to vector<4x128xf32>
    %14 = arith.addf %12, %13 : vector<4x128xf32>
    %15 = math.rsqrt %14 : vector<4x128xf32>
    %c0_8 = arith.constant 0 : index
    %c0_9 = arith.constant 0 : index
    %16 = vector.load %arg3[%c0_8, %c0_9] : memref<1x128xf32, #tpu.memory_space<vmem>>, vector<1x128xf32>
    %17 = arith.subf %0, %6 : vector<4x128xf32>
    %18 = arith.mulf %17, %15 : vector<4x128xf32>
    %19 = vector.broadcast %16 : vector<1x128xf32> to vector<4x128xf32>
    %20 = arith.mulf %19, %18 : vector<4x128xf32>
    %c0_10 = arith.constant 0 : index
    %c0_11 = arith.constant 0 : index
    %21 = vector.load %arg4[%c0_10, %c0_11] : memref<1x128xf32, #tpu.memory_space<vmem>>, vector<1x128xf32>
    %22 = vector.broadcast %21 : vector<1x128xf32> to vector<4x128xf32>
    %23 = arith.addf %20, %22 : vector<4x128xf32>
    %c0_12 = arith.constant 0 : index
    %c0_13 = arith.constant 0 : index
    %24 = vector.load %arg5[%c0_12, %c0_13] : memref<4x128xf32, #tpu.memory_space<vmem>>, vector<4x128xf32>
    tpu.vector_store %arg5[%c0_12, %c0_13], %23 {strides = array<i32>} : memref<4x128xf32, #tpu.memory_space<vmem>>, vector<4x128xf32>,
    return
  }
  func.func @transform_0(%arg0: i32) -> (i32, i32) {
    %c0_i32 = arith.constant 0 : i32
    %c0_i32_0 = arith.constant 0 : i32
    return %arg0, %c0_i32 : i32, i32
  }
  func.func @transform_1(%arg0: i32) -> (i32, i32) {
    %c0_i32 = arith.constant 0 : i32
    %c0_i32_0 = arith.constant 0 : i32
    %c0_i32_1 = arith.constant 0 : i32
    return %c0_i32, %c0_i32_0 : i32, i32
  }
  func.func @transform_2(%arg0: i32) -> (i32, i32) {
    %c0_i32 = arith.constant 0 : i32
    %c0_i32_0 = arith.constant 0 : i32
    %c0_i32_1 = arith.constant 0 : i32
    return %c0_i32, %c0_i32_0 : i32, i32
  }
  func.func @transform_3(%arg0: i32) -> (i32, i32) {
    %c0_i32 = arith.constant 0 : i32
    %c0_i32_0 = arith.constant 0 : i32
    %c0_i32_1 = arith.constant 0 : i32
    return %c0_i32, %c0_i32_0 : i32, i32
  }
  func.func @transform_4(%arg0: i32) -> (i32, i32) {
    %c0_i32 = arith.constant 0 : i32
    %c0_i32_0 = arith.constant 0 : i32
    return %arg0, %c0_i32 : i32, i32
  }
}

</mosaic_0001>

<bundles_post_ra>
// kernel: tile.13
= control target key start
LH: loop header
LB: loop body
LE: loop exit
PB: predicated region body
PF: predicated region fallthrough
CT: control target
= control target key end

     0   :  { %s22_s0 = inlined_call_operand.vmem [shape: f32[32], index: 0, kind: input, shape index: {}]   ;;  %s23_s1 = inlined_call_operand.vmem [shape: f32[4,32], index: 1, kind: output, shape index: {}]  }
   0x1   :  { %v4_v0 = vld [vmem:[%s22_s0] ss:$0 sm:$0xff] }
   0x2   :  { %5 = vst [vmem:[%s23_s1] sm:$0xf] %v4_v0 }

// kernel: tile.14
= control target key start
LH: loop header
LB: loop body
LE: loop exit
PB: predicated region body
PF: predicated region fallthrough
CT: control target
= control target key end

     0   :  { %vm7_vm0 = vcmask 261120   ;;  %s37_s8 = smov 32   ;;  %s38_s9 = smov 64   ;;  %vm13_vm1 = vcmask 1048320   ;;  %vm19_vm2 = vcmask 785920   ;;  %vm25_vm3 = vcmask 523520   ;;  %s55_s0 = inlined_call_operand.vmem [shape: f32[4,32], index: 0, kind: input, shape index: {}]   ;;  %s56_s1 = inlined_call_operand.vmem [shape: f32[1,128], index: 1, kind: output, shape index: {}]  }
   0x1   :  { %v4_v0 = vld [vmem:[%s55_s0] sm:$0xf]  ;;  %s36_s0 = smov 96  }
   0x2   :  { %5 = vst [vmem:[#allocation1] sm:$0xf] %v4_v0 }
   0x9   :  { %v10_v1 = vld [vmem:[#allocation1 + $0x3] sm:$0x1]   ;;  %v22_v2 = vld [vmem:[#allocation1 + $0x1] sm:$0x1]   ;;  %v6_v3 = vld [vmem:[#allocation1] sm:$0x1]  }
   0xa   :  { %11 = vrot.lane.b32.xlu0 %v10_v1, %s36_s0  ;;  %23 = vrot.lane.b32.xlu1 %v22_v2, %s37_s8  ;;  %v16_v4 = vld [vmem:[#allocation1 + $0x2] sm:$0x1]   ;;  %8 = vst.msk [vmem:[#allocation0] sm:$0x1] %vm7_vm0, %v6_v3  }
   0xe   :  { %17 = vrot.lane.b32.xlu0 %v16_v4, %s38_s9 }
  0x7c   :  { %v12_v5 = vpop.permute.xlu0 %11   ;;  %v24_v6 = vpop.permute.xlu1 %23  }
  0x7d   :  { %14 = vst.msk [vmem:[#allocation0] sm:$0x1] %vm13_vm1, %v12_v5  }
  0x80   :  { %v18_v7 = vpop.permute.xlu0 %17  }
  0x81   :  { %20 = vst.msk [vmem:[#allocation0] sm:$0x1] %vm19_vm2, %v18_v7  }
  0x82   :  { %26 = vst.msk [vmem:[#allocation0] sm:$0x1] %vm25_vm3, %v24_v6  }
  0x89   :  { %v30_v8 = vld [vmem:[#allocation0] sm:$0x1] }
  0x8a   :  { %32 = vst [vmem:[%s56_s1] sm:$0x1] %v30_v8 }

// kernel: bert_layer_norm.1
= control target key start
LH: loop header
LB: loop body
LE: loop exit
PB: predicated region body
PF: predicated region fallthrough
CT: control target
= control target key end

     0   :  { %v2286_v0 = vmov 0.0|0.0   ;;  %vm2287_vm0 = vmmov 0   ;;  %v2288_v8 = vmov 0.0   ;;  %s2738_s1 = inlined_call_operand.vmem [shape: f32[128,128], index: 1, kind: input, shape index: {}]   ;;  %s2739_s0 = inlined_call_operand.vmem [shape: f32[4,128], index: 0, kind: input, shape index: {}]   ;;  %s2740_s2 = inlined_call_operand.vmem [shape: f32[1,128], index: 2, kind: input, shape index: {}]   ;;  %s2741_s3 = inlined_call_operand.vmem [shape: f32[1,128], index: 3, kind: input, shape index: {}]   ;;  %s2742_s4 = inlined_call_operand.vmem [shape: f32[4,128], index: 4, kind: output, shape index: {}]  }
   0x1   :  { %1973 = vmatprep.subr.bf16.mxu0 %v2286_v0  ;;  %2117 = vmatprep.subr.bf16.mxu1 %v2286_v0  ;;  %v18_v1 = vld [vmem:[%s2738_s1] sm:$0xff]  ;;  %v19_v2 = vld [vmem:[%s2738_s1 + $0x8] sm:$0xff]  ;;  %v20_v3 = vld [vmem:[%s2738_s1 + $0x10] sm:$0xff] }
   0x2   :  { %v35_v4 = vand.u32 4294901760, %v18_v1  ;;  %v38_v5 = vand.u32 4294901760, %v19_v2  ;;  %v2328_v6 = vld [vmem:[%s2738_s1 + $0x18] sm:$0xff]  ;;  %v41_v7 = vand.u32 4294901760, %v20_v3  ;;  %1585 = vmatprep.mubr.msk.f32.mxu0 %vm2287_vm0, %v2288_v8  ;;  %1795 = vmatprep.mubr.msk.f32.mxu1 %vm2287_vm0, %v2288_v8  ;;  %v2338_v10 = vld [vmem:[%s2738_s1 + $0x20] sm:$0xff]  ;;  %v2343_v11 = vld [vmem:[%s2738_s1 + $0x28] sm:$0xff] }
   0x3   :  { %v44_v9 = vand.u32 4294901760, %v2328_v6  ;;  %v47_v14 = vand.u32 4294901760, %v2338_v10  ;;  %v50_v15 = vand.u32 4294901760, %v2343_v11  ;;  %v2358_v16 = vld [vmem:[%s2738_s1 + $0x30] sm:$0xff]  ;;  %v2363_v17 = vld [vmem:[%s2738_s1 + $0x38] sm:$0xff]  ;;  %v26_v22 = vld [vmem:[%s2738_s1 + $0x40] sm:$0xff] }
   0x4   :  { %v2345_v12 = vpack.c.bf16 %v38_v5, %v35_v4  ;;  %v2368_v18 = vld [vmem:[%s2739_s0] sm:$0xf]  ;;  %v53_v20 = vand.u32 4294901760, %v2358_v16  ;;  %v56_v21 = vand.u32 4294901760, %v2363_v17  ;;  %v27_v23 = vld [vmem:[%s2738_s1 + $0x48] sm:$0xff]  ;;  %v28_v26 = vld [vmem:[%s2738_s1 + $0x50] sm:$0xff]  ;;  %v2411_v35 = vsub.f32 %v18_v1, %v35_v4 }
   0x5   :  { %v2349_v13 = vpack.c.bf16 %v44_v9, %v41_v7  ;;  %v2372_v19 = vpack.c.bf16 %v50_v15, %v47_v14  ;;  %v2385_v24 = vand.u32 4294901760, %v2368_v18  ;;  %v675_v25 = vmul.f32 %v2368_v18, %v2368_v18  ;;  %v29_v27 = vld [vmem:[%s2738_s1 + $0x58] sm:$0xff]  ;;  %v30_v28 = vld [vmem:[%s2738_s1 + $0x60] sm:$0xff]  ;;  %v31_v32 = vld [vmem:[%s2738_s1 + $0x68] sm:$0xff] }
   0x6   :  { %1975 = vmatpush3.bf16.msra.mxu0 %v2345_v12  ;;  %2119 = vmatpush3.bf16.msra.mxu1 %v2345_v12  ;;  %v2400_v29 = vpack.c.bf16 %v56_v21, %v53_v20  ;;  %v59_v30 = vand.u32 4294901760, %v26_v22  ;;  %v62_v31 = vand.u32 4294901760, %v27_v23  ;;  %v32_v33 = vld [vmem:[%s2738_s1 + $0x70] sm:$0xff]  ;;  %v33_v34 = vld [vmem:[%s2738_s1 + $0x78] sm:$0xff]  ;;  %v2419_v37 = vsub.f32 %v19_v2, %v38_v5 }
   0x7   :  { %1976 = vmatprep.subr.bf16.mxu0 %v2286_v0  ;;  %2120 = vmatprep.subr.bf16.mxu1 %v2286_v0  ;;  %v2417_v36 = vsub.f32 %v2368_v18, %v2385_v24  ;;  %v2421_v38 = vsub.f32 %v20_v3, %v41_v7  ;;  %v65_v39 = vand.u32 4294901760, %v28_v26  ;;  %v68_v40 = vand.u32 4294901760, %v29_v27 }
   0x8   :  { %v2423_v41 = vand.u32 4294901760, %v675_v25  ;;  %v71_v42 = vand.u32 4294901760, %v30_v28  ;;  %v74_v43 = vand.u32 4294901760, %v31_v32  ;;  %v77_v44 = vand.u32 4294901760, %v32_v33 }
   0x9   :  { %v80_v45 = vand.u32 4294901760, %v33_v34  ;;  %v2427_v46 = vpack.c.bf16 %v62_v31, %v59_v30  ;;  %v128_v47 = vand.u32 4294901760, %v2411_v35  ;;  %v2744_v48 = vand.u32 4294901760, %v2417_v36 }
   0xa   :  { %1978 = vmatpush3.bf16.msra.mxu0 %v2349_v13  ;;  %2122 = vmatpush3.bf16.msra.mxu1 %v2349_v13  ;;  %v135_v49 = vand.u32 4294901760, %v2419_v37  ;;  %v142_v50 = vand.u32 4294901760, %v2421_v38  ;;  %v2436_v51 = vsub.f32 %v2328_v6, %v44_v9  ;;  %v2439_v52 = vsub.f32 %v675_v25, %v2423_v41 }
   0xb   :  { %1979 = vmatprep.subr.bf16.mxu0 %v2286_v0  ;;  %2123 = vmatprep.subr.bf16.mxu1 %v2286_v0  ;;  %v2441_v53 = vpack.c.bf16 %v68_v40, %v65_v39  ;;  %v2443_v54 = vpack.c.bf16 %v74_v43, %v71_v42  ;;  %v2445_v55 = vpack.c.bf16 %v80_v45, %v77_v44 }
   0xc   :  { %v129_v56 = vsub.f32 %v2411_v35, %v128_v47  ;;  %v2451_v57 = vsub.f32 %v2338_v10, %v47_v14  ;;  %v2454_v58 = vsub.f32 %v2343_v11, %v50_v15  ;;  %v118_v59 = vsub.f32 %v2417_v36, %v2744_v48 }
   0xd   :  { %v136_v60 = vsub.f32 %v2419_v37, %v135_v49  ;;  %v2463_v61 = vsub.f32 %v2421_v38, %v142_v50  ;;  %v149_v62 = vand.u32 4294901760, %v2436_v51  ;;  %v2743_v63 = vand.u32 4294901760, %v2439_v52 }
   0xe   :  { %1981 = vmatpush3.bf16.msra.mxu0 %v2372_v19  ;;  %2125 = vmatpush3.bf16.msra.mxu1 %v2372_v19  ;;  %v2468_v1 = vsub.f32 %v2358_v16, %v53_v20  ;;  %v2471_v2 = vsub.f32 %v2363_v17, %v56_v21  ;;  %v2473_v3 = vsub.f32 %v26_v22, %v59_v30  ;;  %v156_v9 = vand.u32 4294901760, %v2451_v57 }
   0xf   :  { %1982 = vmatprep.subr.bf16.mxu0 %v2286_v0  ;;  %2126 = vmatprep.subr.bf16.mxu1 %v2286_v0  ;;  %v2475_v4 = vsub.f32 %v27_v23, %v62_v31  ;;  %v2477_v5 = vsub.f32 %v28_v26, %v65_v39  ;;  %v2479_v6 = vsub.f32 %v29_v27, %v68_v40  ;;  %v130_v15 = vand.u32 4294901760, %v129_v56 }
  0x10   :  { %v2481_v7 = vsub.f32 %v30_v28, %v71_v42  ;;  %v2486_v10 = vsub.f32 %v31_v32, %v74_v43  ;;  %v2488_v11 = vsub.f32 %v32_v33, %v77_v44  ;;  %v2490_v14 = vsub.f32 %v33_v34, %v80_v45 }
  0x11   :  { %v137_v16 = vand.u32 4294901760, %v136_v60  ;;  %v150_v17 = vsub.f32 %v2436_v51, %v149_v62  ;;  %v163_v20 = vand.u32 4294901760, %v2454_v58  ;;  %v760_v21 = vsub.f32 %v2439_v52, %v2743_v63 }
  0x12   :  { %1984 = vmatpush3.bf16.msra.mxu0 %v2400_v29  ;;  %2128 = vmatpush3.bf16.msra.mxu1 %v2400_v29  ;;  %v170_v22 = vand.u32 4294901760, %v2468_v1  ;;  %v177_v23 = vand.u32 4294901760, %v2471_v2  ;;  %v184_v25 = vand.u32 4294901760, %v2473_v3  ;;  %v191_v26 = vand.u32 4294901760, %v2475_v4 }
  0x13   :  { %1985 = vmatprep.subr.bf16.mxu0 %v2286_v0  ;;  %2129 = vmatprep.subr.bf16.mxu1 %v2286_v0  ;;  %v198_v27 = vand.u32 4294901760, %v2477_v5  ;;  %v205_v28 = vand.u32 4294901760, %v2479_v6  ;;  %v212_v30 = vand.u32 4294901760, %v2481_v7  ;;  %v219_v31 = vand.u32 4294901760, %v2486_v10 }
  0x14   :  { %v226_v32 = vand.u32 4294901760, %v2488_v11  ;;  %v2745_v33 = vand.u32 4294901760, %v2490_v14  ;;  %v2511_v34 = vpack.c.bf16 %v135_v49, %v128_v47  ;;  %v2515_v39 = vpack.c.bf16 %v149_v62, %v142_v50 }
  0x15   :  { %v2517_v40 = vpack.c.bf16 %v163_v20, %v156_v9  ;;  %v2519_v42 = vpack.c.bf16 %v177_v23, %v170_v22  ;;  %v2521_v43 = vpack.c.bf16 %v191_v26, %v184_v25  ;;  %v2523_v44 = vpack.c.bf16 %v205_v28, %v198_v27 }
  0x16   :  { %1987 = vmatpush3.bf16.msra.mxu0 %v2427_v46  ;;  %2131 = vmatpush3.bf16.msra.mxu1 %v2427_v46  ;;  %v2525_v45 = vpack.c.bf16 %v219_v31, %v212_v30  ;;  %v2531_v47 = vpack.c.bf16 %v2745_v33, %v226_v32  ;;  %v119_v49 = vand.u32 4294901760, %v118_v59  ;;  %v761_v56 = vand.u32 4294901760, %v760_v21 }
  0x17   :  { %1988 = vmatprep.subr.bf16.mxu0 %v2286_v0  ;;  %2132 = vmatprep.subr.bf16.mxu1 %v2286_v0  ;;  %v157_v50 = vsub.f32 %v2451_v57, %v156_v9  ;;  %v164_v60 = vsub.f32 %v2454_v58, %v163_v20  ;;  %v1998_v62 = vpack.c.bf16 %v137_v16, %v130_v15  ;;  %v144_v63 = vand.u32 4294901760, %v2463_v61 }
  0x18   :  { %v151_v48 = vand.u32 4294901760, %v150_v17  ;;  %v171_v20 = vsub.f32 %v2468_v1, %v170_v22  ;;  %v178_v33 = vsub.f32 %v2471_v2, %v177_v23  ;;  %v199_v17 = vsub.f32 %v2477_v5, %v198_v27 }
  0x19   :  { %v158_v59 = vand.u32 4294901760, %v157_v50  ;;  %v165_v21 = vand.u32 4294901760, %v164_v60  ;;  %v220_v27 = vsub.f32 %v2486_v10, %v219_v31 }
  0x1a   :  { %1990 = vmatpush3.bf16.msra.mxu0 %v2441_v53  ;;  %2134 = vmatpush3.bf16.msra.mxu1 %v2441_v53  ;;  %v2001_v9 = vpack.c.bf16 %v151_v48, %v144_v63  ;;  %v172_v15 = vand.u32 4294901760, %v171_v20  ;;  %v179_v16 = vand.u32 4294901760, %v178_v33  ;;  %v185_v48 = vsub.f32 %v2473_v3, %v184_v25 }
  0x1b   :  { %1991 = vmatprep.subr.bf16.mxu0 %v2286_v0  ;;  %2135 = vmatprep.subr.bf16.mxu1 %v2286_v0  ;;  %v2004_v61 = vpack.c.bf16 %v165_v21, %v158_v59  ;;  %v192_v63 = vsub.f32 %v2475_v4, %v191_v26  ;;  %v213_v25 = vsub.f32 %v2481_v7, %v212_v30  ;;  %v200_v33 = vand.u32 4294901760, %v199_v17 }
  0x1c   :  { %v2007_v22 = vpack.c.bf16 %v179_v16, %v172_v15  ;;  %v186_v23 = vand.u32 4294901760, %v185_v48  ;;  %v227_v30 = vsub.f32 %v2488_v11, %v226_v32  ;;  %v2746_v59 = vand.u32 4294901760, %v2490_v14 }
  0x1d   :  { %v214_v60 = vand.u32 4294901760, %v213_v25  ;;  %v2025_v15 = vpack.c.bf16 %v2436_v51, %v2421_v38  ;;  %v2034_v38 = vpack.c.bf16 %v2475_v4, %v2473_v3  ;;  %v2037_v51 = vpack.c.bf16 %v2479_v6, %v2477_v5 }
  0x1e   :  { %1993 = vmatpush3.bf16.msra.mxu0 %v2443_v54  ;;  %2137 = vmatpush3.bf16.msra.mxu1 %v2443_v54  ;;  %v234_v21 = vsub.f32 %v2490_v14, %v2746_v59 }
  0x1f   :  { %1994 = vmatprep.subr.bf16.mxu0 %v2286_v0  ;;  %2138 = vmatprep.subr.bf16.mxu1 %v2286_v0 }
  0x20   :  { %v235_v20 = vand.u32 4294901760, %v234_v21 }
  0x22   :  { %1996 = vmatpush3.bf16.msra.mxu0 %v2445_v55  ;;  %2140 = vmatpush3.bf16.msra.mxu1 %v2445_v55 }
  0x23   :  { %1997 = vmatprep.subr.bf16.mxu0 %v2286_v0  ;;  %2141 = vmatprep.subr.bf16.mxu1 %v2286_v0 }
  0x25   :  { %1586 = vmatmul.mubr.f32.vlgmr.msra.gmra.mrb[0].mxu0 %v119_v49  ;;  %1796 = vmatmul.mubr.f32.vlgmr.msra.gmra.mrb[0].mxu1 %v761_v56  ;;  %v193_v49 = vand.u32 4294901760, %v192_v63  ;;  %v206_v56 = vsub.f32 %v2479_v6, %v205_v28 }
  0x26   :  { %1999 = vmatpush3.bf16.msra.mxu0 %v1998_v62  ;;  %2143 = vmatpush3.bf16.msra.mxu1 %v1998_v62  ;;  %v221_v62 = vand.u32 4294901760, %v220_v27 }
  0x27   :  { %2000 = vmatprep.subr.bf16.mxu0 %v2286_v0  ;;  %2144 = vmatprep.subr.bf16.mxu1 %v2286_v0  ;;  %v2010_v26 = vpack.c.bf16 %v193_v49, %v186_v23  ;;  %v207_v50 = vand.u32 4294901760, %v206_v56 }
  0x28   :  { %1620 = vmatprep.mubr.msk.f32.mxu0 %vm2287_vm0, %v2288_v8  ;;  %1830 = vmatprep.mubr.msk.f32.mxu1 %vm2287_vm0, %v2288_v8  ;;  %v2016_v31 = vpack.c.bf16 %v221_v62, %v214_v60 }
  0x29   :  { %v2013_v28 = vpack.c.bf16 %v207_v50, %v200_v33 }
  0x2a   :  { %2002 = vmatpush3.bf16.msra.mxu0 %v2001_v9  ;;  %2146 = vmatpush3.bf16.msra.mxu1 %v2001_v9  ;;  %v228_v9 = vand.u32 4294901760, %v227_v30 }
  0x2b   :  { %2003 = vmatprep.subr.bf16.mxu0 %v2286_v0  ;;  %2147 = vmatprep.subr.bf16.mxu1 %v2286_v0 }
  0x2c   :  { %v2019_v32 = vpack.c.bf16 %v235_v20, %v228_v9 }
  0x2e   :  { %2005 = vmatpush3.bf16.msra.mxu0 %v2004_v61  ;;  %2149 = vmatpush3.bf16.msra.mxu1 %v2004_v61  ;;  %v2022_v61 = vpack.c.bf16 %v2419_v37, %v2411_v35  ;;  %v2028_v35 = vpack.c.bf16 %v2454_v58, %v2451_v57  ;;  %v2031_v37 = vpack.c.bf16 %v2471_v2, %v2468_v1  ;;  %v2747_v1 = vand.u32 4294901760, %v2417_v36 }
  0x2f   :  { %2006 = vmatprep.subr.bf16.mxu0 %v2286_v0  ;;  %2150 = vmatprep.subr.bf16.mxu1 %v2286_v0  ;;  %v2040_v57 = vpack.c.bf16 %v2486_v10, %v2481_v7  ;;  %v2043_v58 = vpack.c.bf16 %v2490_v14, %v2488_v11  ;;  %v2748_v2 = vand.u32 4294901760, %v2439_v52 }
  0x32   :  { %2008 = vmatpush3.bf16.msra.mxu0 %v2007_v22  ;;  %2152 = vmatpush3.bf16.msra.mxu1 %v2007_v22 }
  0x33   :  { %2009 = vmatprep.subr.bf16.mxu0 %v2286_v0  ;;  %2153 = vmatprep.subr.bf16.mxu1 %v2286_v0 }
  0x36   :  { %2011 = vmatpush3.bf16.msra.mxu0 %v2010_v26  ;;  %2155 = vmatpush3.bf16.msra.mxu1 %v2010_v26 }
  0x37   :  { %2012 = vmatprep.subr.bf16.mxu0 %v2286_v0  ;;  %2156 = vmatprep.subr.bf16.mxu1 %v2286_v0 }
  0x3a   :  { %2014 = vmatpush3.bf16.msra.mxu0 %v2013_v28  ;;  %2158 = vmatpush3.bf16.msra.mxu1 %v2013_v28 }
  0x3b   :  { %2015 = vmatprep.subr.bf16.mxu0 %v2286_v0  ;;  %2159 = vmatprep.subr.bf16.mxu1 %v2286_v0 }
  0x3e   :  { %2017 = vmatpush3.bf16.msra.mxu0 %v2016_v31  ;;  %2161 = vmatpush3.bf16.msra.mxu1 %v2016_v31 }
  0x3f   :  { %2018 = vmatprep.subr.bf16.mxu0 %v2286_v0  ;;  %2162 = vmatprep.subr.bf16.mxu1 %v2286_v0 }
  0x42   :  { %2020 = vmatpush3.bf16.msra.mxu0 %v2019_v32  ;;  %2164 = vmatpush3.bf16.msra.mxu1 %v2019_v32 }
  0x43   :  { %2021 = vmatprep.subr.bf16.mxu0 %v2286_v0  ;;  %2165 = vmatprep.subr.bf16.mxu1 %v2286_v0 }
  0x45   :  { %1621 = vmatmul.mubr.f32.vlgmr.msra.gmra.mrb[0].mxu0 %v2385_v24  ;;  %1831 = vmatmul.mubr.f32.vlgmr.msra.gmra.mrb[0].mxu1 %v2423_v41 }
  0x46   :  { %2023 = vmatpush3.bf16.msra.mxu0 %v2022_v61  ;;  %2167 = vmatpush3.bf16.msra.mxu1 %v2022_v61 }
  0x47   :  { %2024 = vmatprep.subr.bf16.mxu0 %v2286_v0  ;;  %2168 = vmatprep.subr.bf16.mxu1 %v2286_v0 }
  0x48   :  { %1655 = vmatprep.mubr.msk.f32.mxu0 %vm2287_vm0, %v2288_v8  ;;  %1865 = vmatprep.mubr.msk.f32.mxu1 %vm2287_vm0, %v2288_v8 }
  0x4a   :  { %2026 = vmatpush3.bf16.msra.mxu0 %v2025_v15  ;;  %2170 = vmatpush3.bf16.msra.mxu1 %v2025_v15 }
  0x4b   :  { %2027 = vmatprep.subr.bf16.mxu0 %v2286_v0  ;;  %2171 = vmatprep.subr.bf16.mxu1 %v2286_v0 }
  0x4e   :  { %2029 = vmatpush3.bf16.msra.mxu0 %v2028_v35  ;;  %2173 = vmatpush3.bf16.msra.mxu1 %v2028_v35 }
  0x4f   :  { %2030 = vmatprep.subr.bf16.mxu0 %v2286_v0  ;;  %2174 = vmatprep.subr.bf16.mxu1 %v2286_v0 }
  0x52   :  { %2032 = vmatpush3.bf16.msra.mxu0 %v2031_v37  ;;  %2176 = vmatpush3.bf16.msra.mxu1 %v2031_v37 }
  0x53   :  { %2033 = vmatprep.subr.bf16.mxu0 %v2286_v0  ;;  %2177 = vmatprep.subr.bf16.mxu1 %v2286_v0 }
  0x56   :  { %2035 = vmatpush3.bf16.msra.mxu0 %v2034_v38  ;;  %2179 = vmatpush3.bf16.msra.mxu1 %v2034_v38 }
  0x57   :  { %2036 = vmatprep.subr.bf16.mxu0 %v2286_v0  ;;  %2180 = vmatprep.subr.bf16.mxu1 %v2286_v0 }
  0x5a   :  { %2038 = vmatpush3.bf16.msra.mxu0 %v2037_v51  ;;  %2182 = vmatpush3.bf16.msra.mxu1 %v2037_v51 }
  0x5b   :  { %2039 = vmatprep.subr.bf16.mxu0 %v2286_v0  ;;  %2183 = vmatprep.subr.bf16.mxu1 %v2286_v0 }
  0x5e   :  { %2041 = vmatpush3.bf16.msra.mxu0 %v2040_v57  ;;  %2185 = vmatpush3.bf16.msra.mxu1 %v2040_v57 }
  0x5f   :  { %2042 = vmatprep.subr.bf16.mxu0 %v2286_v0  ;;  %2186 = vmatprep.subr.bf16.mxu1 %v2286_v0 }
  0x62   :  { %2044 = vmatpush3.bf16.msra.mxu0 %v2043_v58  ;;  %2188 = vmatpush3.bf16.msra.mxu1 %v2043_v58 }
  0x63   :  { %2045 = vmatprep.subr.bf16.mxu0 %v2286_v0  ;;  %2189 = vmatprep.subr.bf16.mxu1 %v2286_v0 }
  0x65   :  { %1656 = vmatmul.mubr.f32.vlgmr.msra.gmra.mrb[0].mxu0 %v2417_v36  ;;  %1866 = vmatmul.mubr.f32.vlgmr.msra.gmra.mrb[0].mxu1 %v2439_v52 }
  0x66   :  { %2047 = vmatpush3.bf16.msra.mxu0 %v2345_v12  ;;  %2191 = vmatpush3.bf16.msra.mxu1 %v2345_v12 }
  0x67   :  { %2048 = vmatprep.subr.bf16.mxu0 %v2286_v0  ;;  %2192 = vmatprep.subr.bf16.mxu1 %v2286_v0 }
  0x68   :  { %1690 = vmatprep.mubr.msk.f32.mxu0 %vm2287_vm0, %v2288_v8  ;;  %1900 = vmatprep.mubr.msk.f32.mxu1 %vm2287_vm0, %v2288_v8 }
  0x6a   :  { %2050 = vmatpush3.bf16.msra.mxu0 %v2349_v13  ;;  %2194 = vmatpush3.bf16.msra.mxu1 %v2349_v13 }
  0x6b   :  { %2051 = vmatprep.subr.bf16.mxu0 %v2286_v0  ;;  %2195 = vmatprep.subr.bf16.mxu1 %v2286_v0 }
  0x6e   :  { %2053 = vmatpush3.bf16.msra.mxu0 %v2372_v19  ;;  %2197 = vmatpush3.bf16.msra.mxu1 %v2372_v19 }
  0x6f   :  { %2054 = vmatprep.subr.bf16.mxu0 %v2286_v0  ;;  %2198 = vmatprep.subr.bf16.mxu1 %v2286_v0 }
  0x72   :  { %2056 = vmatpush3.bf16.msra.mxu0 %v2400_v29  ;;  %2200 = vmatpush3.bf16.msra.mxu1 %v2400_v29 }
  0x73   :  { %2057 = vmatprep.subr.bf16.mxu0 %v2286_v0  ;;  %2201 = vmatprep.subr.bf16.mxu1 %v2286_v0 }
  0x76   :  { %2059 = vmatpush3.bf16.msra.mxu0 %v2427_v46  ;;  %2203 = vmatpush3.bf16.msra.mxu1 %v2427_v46 }
  0x77   :  { %2060 = vmatprep.subr.bf16.mxu0 %v2286_v0  ;;  %2204 = vmatprep.subr.bf16.mxu1 %v2286_v0 }
  0x7a   :  { %2062 = vmatpush3.bf16.msra.mxu0 %v2441_v53  ;;  %2206 = vmatpush3.bf16.msra.mxu1 %v2441_v53 }
  0x7b   :  { %2063 = vmatprep.subr.bf16.mxu0 %v2286_v0  ;;  %2207 = vmatprep.subr.bf16.mxu1 %v2286_v0 }
  0x7e   :  { %2065 = vmatpush3.bf16.msra.mxu0 %v2443_v54  ;;  %2209 = vmatpush3.bf16.msra.mxu1 %v2443_v54 }
  0x7f   :  { %2066 = vmatprep.subr.bf16.mxu0 %v2286_v0  ;;  %2210 = vmatprep.subr.bf16.mxu1 %v2286_v0 }
  0x82   :  { %2068 = vmatpush3.bf16.msra.mxu0 %v2445_v55  ;;  %2212 = vmatpush3.bf16.msra.mxu1 %v2445_v55 }
  0x83   :  { %2069 = vmatprep.subr.bf16.mxu0 %v2286_v0  ;;  %2213 = vmatprep.subr.bf16.mxu1 %v2286_v0 }
  0x85   :  { %1691 = vmatmul.mubr.f32.vlgmr.msra.gmra.mrb[0].mxu0 %v2747_v1  ;;  %1901 = vmatmul.mubr.f32.vlgmr.msra.gmra.mrb[0].mxu1 %v2748_v2 }
  0x86   :  { %2071 = vmatpush3.bf16.msra.mxu0 %v2511_v34  ;;  %2215 = vmatpush3.bf16.msra.mxu1 %v2511_v34 }
  0x87   :  { %2072 = vmatprep.subr.bf16.mxu0 %v2286_v0  ;;  %2216 = vmatprep.subr.bf16.mxu1 %v2286_v0 }
  0x88   :  { %1725 = vmatprep.mubr.msk.f32.mxu0 %vm2287_vm0, %v2288_v8  ;;  %1935 = vmatprep.mubr.msk.f32.mxu1 %vm2287_vm0, %v2288_v8 }
  0x8a   :  { %2074 = vmatpush3.bf16.msra.mxu0 %v2515_v39  ;;  %2218 = vmatpush3.bf16.msra.mxu1 %v2515_v39 }
  0x8b   :  { %2075 = vmatprep.subr.bf16.mxu0 %v2286_v0  ;;  %2219 = vmatprep.subr.bf16.mxu1 %v2286_v0 }
  0x8e   :  { %2077 = vmatpush3.bf16.msra.mxu0 %v2517_v40  ;;  %2221 = vmatpush3.bf16.msra.mxu1 %v2517_v40 }
  0x8f   :  { %2078 = vmatprep.subr.bf16.mxu0 %v2286_v0  ;;  %2222 = vmatprep.subr.bf16.mxu1 %v2286_v0 }
  0x92   :  { %2080 = vmatpush3.bf16.msra.mxu0 %v2519_v42  ;;  %2224 = vmatpush3.bf16.msra.mxu1 %v2519_v42 }
  0x93   :  { %2081 = vmatprep.subr.bf16.mxu0 %v2286_v0  ;;  %2225 = vmatprep.subr.bf16.mxu1 %v2286_v0 }
  0x96   :  { %2083 = vmatpush3.bf16.msra.mxu0 %v2521_v43  ;;  %2227 = vmatpush3.bf16.msra.mxu1 %v2521_v43 }
  0x97   :  { %2084 = vmatprep.subr.bf16.mxu0 %v2286_v0  ;;  %2228 = vmatprep.subr.bf16.mxu1 %v2286_v0 }
  0x9a   :  { %2086 = vmatpush3.bf16.msra.mxu0 %v2523_v44  ;;  %2230 = vmatpush3.bf16.msra.mxu1 %v2523_v44 }
  0x9b   :  { %2087 = vmatprep.subr.bf16.mxu0 %v2286_v0  ;;  %2231 = vmatprep.subr.bf16.mxu1 %v2286_v0 }
  0x9e   :  { %2089 = vmatpush3.bf16.msra.mxu0 %v2525_v45  ;;  %2233 = vmatpush3.bf16.msra.mxu1 %v2525_v45 }
  0x9f   :  { %2090 = vmatprep.subr.bf16.mxu0 %v2286_v0  ;;  %2234 = vmatprep.subr.bf16.mxu1 %v2286_v0 }
  0xa2   :  { %2092 = vmatpush3.bf16.msra.mxu0 %v2531_v47  ;;  %2236 = vmatpush3.bf16.msra.mxu1 %v2531_v47 }
  0xa3   :  { %2093 = vmatprep.subr.bf16.mxu0 %v2286_v0  ;;  %2237 = vmatprep.subr.bf16.mxu1 %v2286_v0 }
  0xa5   :  { %1726 = vmatmul.mubr.f32.vlgmr.msra.gmra.mrb[0].mxu0 %v2385_v24  ;;  %1936 = vmatmul.mubr.f32.vlgmr.msra.gmra.mrb[0].mxu1 %v2423_v41 }
  0xa6   :  { %2095 = vmatpush3.bf16.msra.mxu0 %v2345_v12  ;;  %2239 = vmatpush3.bf16.msra.mxu1 %v2345_v12 }
  0xa7   :  { %2096 = vmatprep.subr.bf16.mxu0 %v2286_v0  ;;  %2240 = vmatprep.subr.bf16.mxu1 %v2286_v0 }
  0xa8   :  { %1760 = vmatprep.mubr.msk.f32.mxu0 %vm2287_vm0, %v2288_v8  ;;  %1970 = vmatprep.mubr.msk.f32.mxu1 %vm2287_vm0, %v2288_v8 }
  0xaa   :  { %2098 = vmatpush3.bf16.msra.mxu0 %v2349_v13  ;;  %2242 = vmatpush3.bf16.msra.mxu1 %v2349_v13 }
  0xab   :  { %2099 = vmatprep.subr.bf16.mxu0 %v2286_v0  ;;  %2243 = vmatprep.subr.bf16.mxu1 %v2286_v0 }
  0xae   :  { %2101 = vmatpush3.bf16.msra.mxu0 %v2372_v19  ;;  %2245 = vmatpush3.bf16.msra.mxu1 %v2372_v19 }
  0xaf   :  { %2102 = vmatprep.subr.bf16.mxu0 %v2286_v0  ;;  %2246 = vmatprep.subr.bf16.mxu1 %v2286_v0 }
  0xb2   :  { %2104 = vmatpush3.bf16.msra.mxu0 %v2400_v29  ;;  %2248 = vmatpush3.bf16.msra.mxu1 %v2400_v29 }
  0xb3   :  { %2105 = vmatprep.subr.bf16.mxu0 %v2286_v0  ;;  %2249 = vmatprep.subr.bf16.mxu1 %v2286_v0 }
  0xb6   :  { %2107 = vmatpush3.bf16.msra.mxu0 %v2427_v46  ;;  %2251 = vmatpush3.bf16.msra.mxu1 %v2427_v46 }
  0xb7   :  { %2108 = vmatprep.subr.bf16.mxu0 %v2286_v0  ;;  %2252 = vmatprep.subr.bf16.mxu1 %v2286_v0 }
  0xba   :  { %2110 = vmatpush3.bf16.msra.mxu0 %v2441_v53  ;;  %2254 = vmatpush3.bf16.msra.mxu1 %v2441_v53 }
  0xbb   :  { %2111 = vmatprep.subr.bf16.mxu0 %v2286_v0  ;;  %2255 = vmatprep.subr.bf16.mxu1 %v2286_v0 }
  0xbe   :  { %2113 = vmatpush3.bf16.msra.mxu0 %v2443_v54  ;;  %2257 = vmatpush3.bf16.msra.mxu1 %v2443_v54 }
  0xbf   :  { %2114 = vmatprep.subr.bf16.mxu0 %v2286_v0  ;;  %2258 = vmatprep.subr.bf16.mxu1 %v2286_v0 }
  0xc2   :  { %2116 = vmatpush3.bf16.msra.mxu0 %v2445_v55  ;;  %2260 = vmatpush3.bf16.msra.mxu1 %v2445_v55 }
  0xc5   :  { %1761 = vmatmul.mubr.f32.vlgmr.msra.gmra.mrb[0].mxu0 %v2385_v24  ;;  %1971 = vmatmul.mubr.f32.vlgmr.msra.gmra.mrb[0].mxu1 %v2423_v41  ;;  %v1347_v24 = vld [vmem:[%s2740_s2] ss:$0 sm:$0xff] }
  0xc6   :  { %v1348_v41 = vld [vmem:[%s2741_s3] ss:$0 sm:$0xff] }
 0x198   :  { %v671_v8 = vpop.f32.mrb[0].mxu0  ;;  %v1313_v12 = vpop.f32.mrb[0].mxu1 }
 0x199   :  { %v1317_v13 = vmul.f32 0.03125, %v671_v8  ;;  %v1762_v19 = vpop.f32.mrb[1].mxu0  ;;  %v1972_v29 = vpop.f32.mrb[1].mxu1  ;;  %v1318_v46 = vmul.f32 0.03125, %v1313_v12 }
 0x19b   :  { %v1319_v36 = vmul.f32 %v1317_v13, %v1317_v13  ;;  %v1325_v0 = vsub.f32 %v2368_v18, %v1317_v13 }
 0x19d   :  { %v1320_v52 = vsub.f32 %v1318_v46, %v1319_v36 }
 0x19f   :  { %v1321_v53 = vmax.f32 %v1320_v52, 0.0 }
 0x1a1   :  { %v1322_v54 = vadd.f32 1e-12, %v1321_v53 }
 0x1a3   :  { %2284 = vrsqrt.f32 %v1322_v54 }
 0x1ad   :  { %v2285_v3 = vpop.eup %2284 }
 0x1ae   :  { %v1326_v55 = vmul.f32 %v2285_v3, %v1325_v0 }
 0x1b0   :  { %v1333_v4 = vmul.f32 %v1347_v24, %v1326_v55 }
 0x1b2   :  { %v1341_v5 = vadd.f32 %v1348_v41, %v1333_v4 }
 0x1b4   :  { %1342 = vst [vmem:[%s2742_s4] sm:$0xf] %v1341_v5 }

</bundles_post_ra>
